<compile_context>
chip_gen: v7x
topology: tpu7x:2x2x1
jax: 0.10.0
libtpu: 0.0.40
codegen_flags: <defaults>
</compile_context>

<pallas_src>
import math

import jax
import jax.numpy as jnp
from jax import lax
from jax.experimental import pallas as pl
from jax.experimental.pallas import tpu as pltpu


def _round_up(x, m):
    return (x + m - 1) // m * m


def patch_embed_kernel(x_ref, w_ref, b_ref, o_ref):
    # x_ref: (tm, K) flattened patch rows
    # w_ref: (K, tn)  projection tile (resident across grid when tn == E_pad)
    # b_ref: (1, tn)  bias (f32)
    acc = jnp.dot(x_ref[...], w_ref[...], preferred_element_type=jnp.float32)
    acc = acc + b_ref[...]
    o_ref[...] = acc.astype(o_ref.dtype)


def _patchify(x, patch_size, dtype):
    """(B, C, H, W) -> (B*nH*nW, C*P*P); per-patch element order is (c, ph, pw),
    matching torch Conv2d weight flattening (E, C, P, P) -> (E, C*P*P).
    The dtype cast is fused into this single layout pass."""
    B, C, H, W = x.shape
    P = patch_size
    nH, nW = H // P, W // P
    x = x.astype(dtype)
    x = x.reshape(B, C, nH, P, nW, P)
    x = x.transpose(0, 2, 4, 1, 3, 5)          # (B, nH, nW, C, P, P)
    return x.reshape(B * nH * nW, C * P * P), nH * nW


def _vmem_capacity_bytes():
    try:
        return int(pltpu.get_tpu_info().vmem_capacity_bytes)
    except Exception:
        return 64 << 20          # conservative: v7x per-TensorCore VMEM


def _supports_pipeline_mode():
    if not hasattr(pl, "Buffered"):
        return False
    try:
        pl.BlockSpec((8, 128), lambda i: (0, 0), pipeline_mode=pl.Buffered(1))
        return True
    except TypeError:
        return False


def patch_embed_forward(x, w_conv, b, *, patch_size, tm=512,
                        compute_dtype=jnp.bfloat16, out_dtype=None):
    """x: (B, C, H, W); w_conv: (E, C, P, P) (torch Conv2d layout); b: (E,).
    Returns (B, num_patches, E) == proj(x).flatten(2).transpose(1, 2)."""
    B, C, H, W = x.shape
    E = w_conv.shape[0]
    P = patch_size
    assert H % P == 0 and W % P == 0, "image size must be divisible by patch size"

    op_dtype = jnp.dtype(compute_dtype if compute_dtype is not None else x.dtype)
    out_dtype = jnp.dtype(out_dtype if out_dtype is not None else x.dtype)
    x_sz = op_dtype.itemsize
    o_sz = out_dtype.itemsize

    xr, num_patches = _patchify(x, P, op_dtype)           # (M, K) in op dtype
    M, K = xr.shape

    # Only the output feature dim is padded (lane-dense stores). K and M use
    # full-extent blocks / cdiv grids (exempt from the (8,128) rule).
    E_pad = _round_up(E, 128)
    w2d = w_conv.reshape(E, K).T.astype(op_dtype)          # (K, E)
    wp = jnp.pad(w2d, ((0, 0), (0, E_pad - E)))
    bp = jnp.pad(b.astype(jnp.float32).reshape(1, E), ((0, 0), (0, E_pad - E)))

    # Row tile: big (amortize ~0.35us/step), dtype-aware sublane multiple,
    # and at least 2 grid steps so v7x megacore can shard the M axis.
    sub = 8 * max(1, 4 // x_sz)                            # 8 for f32, 16 for bf16
    tm_eff = max(sub, min(_round_up(tm, sub), _round_up(pl.cdiv(M, 2), sub)))

    resident_w = _supports_pipeline_mode()
    budget = int(0.75 * _vmem_capacity_bytes())            # ~48 MiB on v7x, ~96 MiB v5e/v6e
    slack = 4 << 20

    def footprint(tm_, tn_):
        w_bufs = 1 if (resident_w and tn_ == E_pad) else 2
        return (2 * tm_ * K * x_sz          # double-buffered activation rows
                + w_bufs * K * tn_ * x_sz   # weight (resident or double-buffered)
                + w_bufs * tn_ * 4          # bias (f32)
                + 2 * tm_ * tn_ * o_sz      # double-buffered output rows
                + tm_ * tn_ * 4)            # f32 matmul intermediate

    # Shrink the E tile (then the row tile) until the plan fits the budget.
    # For typical ViT shapes tn == E_pad and the weight stays resident.
    tn = E_pad
    while (footprint(tm_eff, tn) + slack > budget and tn > 256
           and (tn // 2) % 128 == 0):
        tn //= 2
    while footprint(tm_eff, tn) + slack > budget and tm_eff > sub:
        tm_eff = max(sub, _round_up(tm_eff // 2, sub))

    fp = footprint(tm_eff, tn)
    vmem_limit = int(max(min(fp + slack, budget), fp + (1 << 20), 16 << 20))

    grid_m = pl.cdiv(M, tm_eff)
    grid_e = E_pad // tn

    if grid_e == 1:
        const_kw = dict(pipeline_mode=pl.Buffered(1)) if resident_w else {}
        grid = (grid_m,)
        in_specs = [
            pl.BlockSpec((tm_eff, K), lambda i: (i, 0)),              # patch rows
            pl.BlockSpec((K, E_pad), lambda i: (0, 0), **const_kw),   # weight (resident)
            pl.BlockSpec((1, E_pad), lambda i: (0, 0), **const_kw),   # bias
        ]
        out_specs = pl.BlockSpec((tm_eff, E_pad), lambda i: (i, 0))
        dim_sem = ("parallel",)
    else:
        # Very large embed dims: tile E (innermost) so the weight tile fits
        # VMEM while the x block is reused across E tiles.
        grid = (grid_m, grid_e)
        in_specs = [
            pl.BlockSpec((tm_eff, K), lambda i, j: (i, 0)),
            pl.BlockSpec((K, tn), lambda i, j: (0, j)),
            pl.BlockSpec((1, tn), lambda i, j: (0, j)),
        ]
        out_specs = pl.BlockSpec((tm_eff, tn), lambda i, j: (i, j))
        dim_sem = ("parallel", "arbitrary")

    out2d = pl.pallas_call(
        patch_embed_kernel,
        out_shape=jax.ShapeDtypeStruct((M, E_pad), out_dtype),
        grid_spec=pltpu.PrefetchScalarGridSpec(
            num_scalar_prefetch=0,
            grid=grid,
            in_specs=in_specs,
            out_specs=out_specs,
        ),
        compiler_params=pltpu.CompilerParams(
            dimension_semantics=dim_sem,
            vmem_limit_bytes=vmem_limit,
        ),
    )(xr, wp, bp)

    if E_pad != E:
        out2d = out2d[:, :E]
    return out2d.reshape(B, num_patches, E)


def init_patch_embed_params(key, in_chans, embed_dim, patch_size, dtype=jnp.float32):
    """Deterministic init mimicking nn.Conv2d defaults (kaiming uniform)."""
    fan_in = in_chans * patch_size * patch_size
    bound = 1.0 / math.sqrt(fan_in)
    kw, kb = jax.random.split(key)
    w = jax.random.uniform(kw, (embed_dim, in_chans, patch_size, patch_size),
                           minval=-bound, maxval=bound, dtype=dtype)
    b = jax.random.uniform(kb, (embed_dim,),
                           minval=-bound, maxval=bound, dtype=dtype)
    return w, b


if __name__ == "__main__":
    # Small PatchEmbed-like shapes: batch=2, in_chans=3, img=16, patch=4, embed=64.
    B, C, IMG, P, E = 2, 3, 16, 4, 64

    key = jax.random.PRNGKey(0)
    kx, kp = jax.random.split(key)
    x = jax.random.normal(kx, (B, C, IMG, IMG), dtype=jnp.float32)
    w, b = init_patch_embed_params(kp, C, E, P)

    # Independent pure-JAX reference with true conv semantics (torch layout).
    y = lax.conv_general_dilated(x, w, window_strides=(P, P), padding="VALID",
                                 dimension_numbers=("NCHW", "OIHW", "NCHW"))
    y = y + b.reshape(1, E, 1, 1)
    ref = y.reshape(B, E, -1).transpose(0, 2, 1)     # flatten(2).transpose(1, 2)

    num_patches = (IMG // P) * (IMG // P)

    # Default path: bf16 MXU operands, f32 accumulation (loosened tolerance).
    out_bf16 = jax.block_until_ready(patch_embed_forward(x, w, b, patch_size=P))
    assert out_bf16.shape == (B, num_patches, E)
    assert jnp.allclose(out_bf16, ref, atol=5e-2, rtol=5e-2), \
        float(jnp.max(jnp.abs(out_bf16 - ref)))

    # Opt-in full-precision path: matches the f32 conv reference tightly.
    out_f32 = jax.block_until_ready(
        patch_embed_forward(x, w, b, patch_size=P, compute_dtype=jnp.float32))
    assert jnp.allclose(out_f32, ref, atol=1e-5, rtol=1e-5)

    print("KERNEL_OK")
</pallas_src>

<mosaic_0001>
module attributes {stable_mosaic.version = 11 : i64} {
  func.func @patch_embed_kernel(%arg0: i32, %arg1: memref<16x48xbf16, #tpu.memory_space<vmem>>, %arg2: memref<48x128xbf16, #tpu.memory_space<vmem>>, %arg3: memref<1x128xf32, #tpu.memory_space<vmem>>, %arg4: memref<16x128xf32, #tpu.memory_space<vmem>>) attributes {dimension_semantics = [#tpu.dimension_semantics<parallel>], iteration_bounds = array<i64: 2>, scalar_prefetch = 0 : i64, scratch_operands = 0 : i64, tpu.core_type = #tpu.core_type<tc>, window_params = [{transform_indices = @transform_0, window_bounds = array<i64: 16, 48>}, {pipeline_mode = #tpu.pipeline_mode<synchronous>, transform_indices = @transform_1, window_bounds = array<i64: 48, 128>}, {pipeline_mode = #tpu.pipeline_mode<synchronous>, transform_indices = @transform_2, window_bounds = array<i64: 1, 128>}, {transform_indices = @transform_3, window_bounds = array<i64: 16, 128>}]} {
    %c0 = arith.constant 0 : index
    %c0_0 = arith.constant 0 : index
    %0 = vector.load %arg1[%c0, %c0_0] : memref<16x48xbf16, #tpu.memory_space<vmem>>, vector<16x48xbf16>
    %c0_1 = arith.constant 0 : index
    %c0_2 = arith.constant 0 : index
    %1 = vector.load %arg2[%c0_1, %c0_2] : memref<48x128xbf16, #tpu.memory_space<vmem>>, vector<48x128xbf16>
    %cst = arith.constant dense<0.000000e+00> : vector<16x128xf32>
    %2 = tpu.matmul %0, %1, %cst {dimension_numbers = #tpu.dot_dimension_numbers<[1], [0], [0], [1], [0, 0, 1, 1], [], []>} : vector<16x48xbf16>, vector<48x128xbf16>, vector<16x128xf32> -> vector<16x128xf32>
    %c0_3 = arith.constant 0 : index
    %c0_4 = arith.constant 0 : index
    %3 = vector.load %arg3[%c0_3, %c0_4] : memref<1x128xf32, #tpu.memory_space<vmem>>, vector<1x128xf32>
    %4 = vector.broadcast %3 : vector<1x128xf32> to vector<16x128xf32>
    %5 = arith.addf %2, %4 : vector<16x128xf32>
    %c0_5 = arith.constant 0 : index
    %c0_6 = arith.constant 0 : index
    %6 = vector.load %arg4[%c0_5, %c0_6] : memref<16x128xf32, #tpu.memory_space<vmem>>, vector<16x128xf32>
    tpu.vector_store %arg4[%c0_5, %c0_6], %5 {strides = array<i32>} : memref<16x128xf32, #tpu.memory_space<vmem>>, vector<16x128xf32>,
    return
  }
  func.func @transform_0(%arg0: i32) -> (i32, i32) {
    %c0_i32 = arith.constant 0 : i32
    %c0_i32_0 = arith.constant 0 : i32
    return %arg0, %c0_i32 : i32, i32
  }
  func.func @transform_1(%arg0: i32) -> (i32, i32) {
    %c0_i32 = arith.constant 0 : i32
    %c0_i32_0 = arith.constant 0 : i32
    %c0_i32_1 = arith.constant 0 : i32
    return %c0_i32, %c0_i32_0 : i32, i32
  }
  func.func @transform_2(%arg0: i32) -> (i32, i32) {
    %c0_i32 = arith.constant 0 : i32
    %c0_i32_0 = arith.constant 0 : i32
    %c0_i32_1 = arith.constant 0 : i32
    return %c0_i32, %c0_i32_0 : i32, i32
  }
  func.func @transform_3(%arg0: i32) -> (i32, i32) {
    %c0_i32 = arith.constant 0 : i32
    %c0_i32_0 = arith.constant 0 : i32
    return %arg0, %c0_i32 : i32, i32
  }
}

</mosaic_0001>

<bundles_post_ra>
// kernel: tpu_custom_call.1
= control target key start
LH: loop header
LB: loop body
LE: loop exit
PB: predicated region body
PF: predicated region fallthrough
CT: control target
= control target key end

     0   :  { %8 = vsyncpa [#allocation3], 0  ;;  %s864_s0 = inlined_call_operand.hbm [shape: bf16[32,48], index: 0, kind: input, shape index: {}]   ;;  %s865_s1 = inlined_call_operand.hbm [shape: bf16[48,128], index: 1, kind: input, shape index: {}]   ;;  %s866_s2 = inlined_call_operand.vmem [shape: f32[1,128], index: 2, kind: input, shape index: {}]   ;;  %s867_s3 = inlined_call_operand.hbm [shape: f32[32,128], index: 3, kind: output, shape index: {}]  }
   0x1   :  { %10 = vsyncpa [#allocation3 + $0x1], 0 }
   0x2   :  { %11 = vsyncpa [#allocation6], 0 }
   0x3   :  { %12 = vsyncpa [#allocation4], 0 }
   0x4   :  { %14 = vsyncpa [#allocation4 + $0x1], 0  ;;  %s653_s12 = smov 0   ;;  %s655_s13 = smov 0  }
   0x5   :  { %s657_s14 = smov 0   ;;  %s659_s15 = smov 0  }
   0x6 LB: > { %s674_s16 = sadd.s32 4294967295, %s622_s15   ;;  %s389_s17 = sadd.s32 4294967294, %s622_s15   ;;  %s622_s15 = sphi %s659_s15, %s887_s15   ;;  %s618_s14 = sphi %s657_s14, %s886_s14   ;;  %s614_s13 = sphi %s655_s13, %s885_s13   ;;  %s610_s12 = sphi %s653_s12, %s884_s12  }
   0x7   : > { %p40_p0 = scmp.ne.s32.totalorder %s614_s13, %s610_s12  ;;  %p868_p1 = scmp.eq.s32.totalorder %s674_s16, 0 }
   0x8   : > { %p112_p3 = scmp.eq.s32.totalorder %s389_s17, 1  ;;  %p390_p5 = scmp.ge.s32.totalorder %s622_s15, 1 }
   0x9   : > { %p683_p4 = por %p868_p1, %p40_p0  ;;  %p119_p7 = scmp.lt.s32.totalorder %s622_s15, 3 }
   0xa   : > { %p688_p6 = por %p112_p3, %p40_p0  ;;  %s624_s21 = smov [#allocation5]  }
   0xb   : > { %s871_s18 = scalar_select %p683_p4, 1, 0 }
   0xc   : > { %s872_s19 = scalar_select %p688_p6, 1, 0 }
   0xd   : > { %p693_p8 = pnand %p390_p5, %p119_p7  ;;  %s131_s22 = sshll.u32 %s624_s21, 4  ;;  %s697_s22 = int_to_ptr.vmem [resolvable:$true] %s131_s22 }
   0xe   : > { %s709_s24 = sadd.s32 1, %s622_s15   ;;  %s27_s25 = sadd.s32 1, %s618_s14 }
   0xf   : > { %s873_s20 = scalar_select %p693_p8, 1, 0 }
  0x10   : > { %p435_p9 = pneg %p693_p8  ;;  %s24_s26 = ssub.s32 %s622_s15, %s709_s24 }
  0x11   : > { %s494_s29 = scalar_lea.hbm %s865_s1, 384 }
  0x12   : > { %p704_p11 = pnand %p435_p9, %p868_p1  ;;  %p495_p12 = scmp.ne.s32.totalorder %s865_s1, %s494_s29 }
  0x13   : > { %p501_p5 = scmp.lt.u32.totalorder %s494_s29, %s865_s1 }
  0x14   : > { %p496_p13 = pneg %p704_p11 }
  0x16   : > { %p497_p0 = pnand %p496_p13, %p495_p12 }
  0x18   : > { %p498_p3 = pneg %p497_p0 }
  0x1a   : > { %p503_p7 = pnand %p501_p5, %p498_p3 }
  0x1c   : > { %506 = shalt.err (!%p503_p7)
}
  0x1d   : > { %s507_s7 = scalar_lea.vmem %s697_s22, 384  ;;  %p515_p2 = scmp.lt.s32.totalorder %s697_s22, %s697_s22 }
  0x1e   : > { %p508_p9 = scmp.ne.s32.totalorder %s697_s22, %s507_s7  ;;  %p516_p6 = scmp.lt.s32.totalorder %s507_s7, %s507_s7 }
  0x20   : > { %p510_p10 = pnand %p508_p9, %p496_p13  ;;  %p517_p4 = por %p516_p6, %p515_p2 }
  0x22   : > { %p511_p1 = pneg %p510_p10 }
  0x24   : > { %p518_p8 = pnand %p517_p4, %p511_p1 }
  0x26   : > { %521 = shalt.err (!%p518_p8)
}
  0x27   : > { %s625_s8 = smov 64   ;;  %s626_s9 = smov 4  }
  0x28   : > { %438 = dma.hbm_to_vmem [thread:$0]  (!%p704_p11), %s865_s1, 384, %s697_s22, [#allocation6], %s625_s8, %s625_s8, %s626_s9  }
  0x29   : > { %p25_p1 = scmp.eq.s32.totalorder %s24_s26, 0  ;;  %p34_p2 = scmp.ne.s32.totalorder %s618_s14, %s614_s13 }
  0x2a   : > { %p35_p4 = scmp.eq.s32.totalorder %s622_s15, 0  ;;  %p448_p6 = scmp.lt.s32.totalorder %s622_s15, 2 }
  0x2b   : > { %s743_s17 = scalar_select %p25_p1, %s618_s14, %s27_s25  }
  0x2c   : > { %p36_p8 = por %p35_p4, %p34_p2  ;;  %p875_p10 = scmp.eq.s32.totalorder %s674_s16, 1 }
  0x2d   : > { %s148_s23 = sand.u32 1, %s618_s14   ;;  %s411_s27 = sshll.u32 %s622_s15, 7 }
  0x2e   : > { %p747_p12 = por %p875_p10, %p34_p2  ;;  %s393_s28 = sshll.u32 %s148_s23, 3 }
  0x2f   : > { %s756_s4 = scalar_lea.hbm %s864_s0, %s411_s27  ;;  %s152_s22 = scalar_lea.vmem [#allocation2], %s393_s28 }
  0x30   : > { %s159_s25 = sshll.u32 %s152_s22, 4  ;;  %p758_p11 = pnand %p448_p6, %p36_p8  ;;  %s762_s25 = int_to_ptr.vmem [resolvable:$true] %s159_s25 }
  0x31   : > { %s764_s5 = scalar_lea.sflag [#allocation3], %s148_s23  ;;  %s522_s6 = scalar_lea.hbm %s756_s4, 128 }
  0x32   : > { %p523_p13 = scmp.ne.s32.totalorder %s756_s4, %s522_s6  ;;  %p524_p0 = pneg %p758_p11 }
  0x33   : > { %s527_s11 = scalar_lea.hbm %s864_s0, 256  ;;  %p528_p7 = scmp.lt.u32.totalorder %s756_s4, %s864_s0 }
  0x34   : > { %p525_p3 = pnand %p524_p0, %p523_p13  ;;  %p529_p9 = scmp.lt.u32.totalorder %s527_s11, %s522_s6 }
  0x35   : > { %p531_p2 = scmp.lt.u32.totalorder %s522_s6, %s756_s4 }
  0x36   : > { %p526_p5 = pneg %p525_p3  ;;  %p530_p1 = por %p529_p9, %p528_p7 }
  0x38   : > { %p532_p4 = por %p531_p2, %p530_p1 }
  0x3a   : > { %p533_p6 = pnand %p532_p4, %p526_p5 }
  0x3c   : > { %536 = shalt.err (!%p533_p6)
}
  0x3d   : > { %s537_s23 = scalar_lea.vmem %s762_s25, 128  ;;  %s627_s29 = smov [#allocation2]  }
  0x3e   : > { %p538_p8 = scmp.ne.s32.totalorder %s762_s25, %s537_s23  ;;  %s542_s30 = sshll.u32 %s627_s29, 4  ;;  %s543_s30 = int_to_ptr.vmem [resolvable:$false] %s542_s30 }
  0x3f   : > { %s544_s22 = scalar_lea.vmem %s543_s30, 256  ;;  %p545_p3 = scmp.lt.s32.totalorder %s762_s25, %s543_s30 }
  0x40   : > { %p540_p10 = pnand %p538_p8, %p524_p0  ;;  %p546_p7 = scmp.lt.s32.totalorder %s544_s22, %s537_s23 }
  0x42   : > { %p541_p13 = pneg %p540_p10  ;;  %p547_p9 = por %p546_p7, %p545_p3 }
  0x44   : > { %p548_p1 = pnand %p547_p9, %p541_p13 }
  0x46   : > { %551 = shalt.err (!%p548_p1)
}
  0x47   : > { %442 = dma.hbm_to_vmem [thread:$0]  (!%p758_p11), %s756_s4, 128, %s762_s25, %s764_s5, %s625_s8, %s625_s8, %s626_s9  }
  0x48   : > { %p878_p0 = scmp.ne.s32.totalorder %s873_s20, 0 }
  0x49   : > { %s798_s6 = sand.u32 (!%p878_p0), 1, %s614_s13   ;;  %p879_p5 = scmp.ne.s32.totalorder (!%p878_p0), %s871_s18, 0 }
  0x4a   : > { %171 = sbr.rel (%p878_p0) target bundleno = 329 (0x149), region = 32  ;;  %s397_s7 = sshll.u32 (!%p878_p0), %s798_s6, 3 }
  0x4b   : > { %s174_s10 = scalar_lea.sflag (!%p878_p0), [#allocation3], %s798_s6  ;;  %s177_s11 = scalar_lea.vmem (!%p878_p0), [#allocation2], %s397_s7 }
  0x51   : > { %597 = dma.done.wait (%p879_p5), %s174_s10, 128  }
  0x52   : > { %599 = vsyncadd (%p879_p5), %s174_s10, 4294967168  ;;  %p880_p2 = scmp.eq.s32.totalorder %s674_s16, 0 }
  0x54   : > { %601 = dma.done.wait (%p880_p2), [#allocation6], 384   ;;  %p881_p11 = pmov %p880_p2 }
  0x55   : > { %v628_v0 = vmov 0.0   ;;  %vm629_vm0 = vmmov 0   ;;  %v490_v1 = vld [vmem:[#allocation5] sm:$0xff]   ;;  %v491_v2 = vld [vmem:[#allocation5 + $0x8] sm:$0xff]   ;;  %v492_v3 = vld [vmem:[#allocation5 + $0x10] sm:$0xff]   ;;  %vm245_vm1 = vcmask 392192  }
  0x56   : > { %603 = vsyncadd (%p881_p11), [#allocation6], 4294966912  ;;  %417 = vmatprep.subr.bf16.mxu0 %v628_v0  ;;  %423 = vmatprep.mubr.msk.bf16.mxu0 %vm629_vm0, %v628_v0  ;;  %v493_v4 = vld [vmem:[%s177_s11] sm:$0xff]   ;;  %s399_s18 = sshll.u32 %s798_s6, 4  ;;  %s412_s25 = sshll.u32 %s674_s16, 8 }
  0x57   : > { %418 = vmatpush3.bf16.msra.mxu0 %v490_v1  ;;  %v400_v5 = vld [vmem:[%s866_s2] ss:$0 sm:$0xff]  ;;  %s203_s9 = scalar_lea.vmem [#allocation7], %s399_s18  ;;  %s820_s27 = scalar_lea.hbm %s867_s3, %s412_s25 }
  0x58   : > { %419 = vmatprep.subr.bf16.mxu0 %v628_v0  ;;  %s306_s4 = sshll.u32 %s203_s9, 4  ;;  %s293_s28 = scalar_lea.sflag [#allocation4], %s798_s6  ;;  %s815_s4 = int_to_ptr.vmem [resolvable:$true] %s306_s4 }
  0x59   : > { %s552_s16 = scalar_lea.vmem %s815_s4, 256  ;;  %s630_s23 = smov [#allocation7]  }
  0x5a   : > { %p553_p4 = scmp.ne.s32.totalorder %s815_s4, %s552_s16  ;;  %s556_s29 = sshll.u32 %s630_s23, 4  ;;  %s557_s29 = int_to_ptr.vmem [resolvable:$false] %s556_s29 }
  0x5b   : > { %420 = vmatpush3.bf16.msra.mxu0 %v491_v2  ;;  %s558_s30 = scalar_lea.vmem %s557_s29, 512  ;;  %p559_p10 = scmp.lt.s32.totalorder %s815_s4, %s557_s29 }
  0x5c   : > { %421 = vmatprep.subr.bf16.mxu0 %v628_v0  ;;  %p554_p6 = pnand %p553_p4, %p747_p12  ;;  %p560_p13 = scmp.lt.s32.totalorder %s558_s30, %s552_s16 }
  0x5e   : > { %p555_p8 = pneg %p554_p6  ;;  %p561_p3 = por %p560_p13, %p559_p10 }
  0x5f   : > { %422 = vmatpush3.bf16.msra.mxu0 %v492_v3 }
  0x60   : > { %p562_p7 = pnand %p561_p3, %p555_p8 }
  0x62   : > { %424 = vmatmul.mubr.msk.bf16.vlgmr.msra.gmra.mrb[0].mxu0 %vm245_vm1, %v493_v4 }
 0x135   : > { %v283_v6 = vpop.f32.mrb[0].mxu0 }
 0x136   : > { %v284_v7 = vadd.f32 %v400_v5, %v283_v6  ;;  %v425_v8 = vpop.f32.mrb[1].mxu0 }
 0x137   : > { %v286_v9 = vpop.f32.mrb[2].mxu0 }
 0x138   : > { %290 = vst [vmem:[%s203_s9] sm:$0xff] %v284_v7  ;;  %v287_v10 = vadd.f32 %v400_v5, %v286_v9  ;;  %v426_v11 = vpop.f32.mrb[3].mxu0 }
 0x13a   : > { %291 = vst [vmem:[%s203_s9 + $0x8] sm:$0xff] %v287_v10 }
 0x13b   : > { %565 = shalt.err (!%p562_p7)
}
 0x13c   : > { %s566_s22 = scalar_lea.hbm %s820_s27, 256  ;;  %s570_s11 = scalar_lea.hbm %s867_s3, 512 }
 0x13d   : > { %p567_p9 = scmp.ne.s32.totalorder %s820_s27, %s566_s22  ;;  %p571_p5 = scmp.lt.u32.totalorder %s820_s27, %s867_s3 }
 0x13e   : > { %p572_p2 = scmp.lt.u32.totalorder %s570_s11, %s566_s22  ;;  %p574_p4 = scmp.lt.u32.totalorder %s566_s22, %s820_s27 }
 0x13f   : > { %p568_p1 = pnand %p567_p9, %p747_p12 }
 0x140   : > { %p573_p11 = por %p572_p2, %p571_p5 }
 0x141   : > { %p569_p0 = pneg %p568_p1 }
 0x142   : > { %p575_p6 = por %p574_p4, %p573_p11 }
 0x144   : > { %p576_p8 = pnand %p575_p6, %p569_p0 }
 0x146   : > { %579 = shalt.err (!%p576_p8)
}
 0x147   : > { %s631_s8 = smov 128   ;;  %s632_s9 = smov 8  }
 0x148   : > { %433 = dma.vmem_to_hbm [thread:$0]  (%p747_p12), %s815_s4, 256, %s820_s27, %s293_s28, %s631_s8, %s631_s8, %s632_s9  }
 0x149 PF: > { %s321_s25 = sand.u32 1, %s610_s12   ;;  %p882_p10 = scmp.ne.s32.totalorder %s872_s19, 0 }
 0x14a   : > { %p883_p13 = scmp.ge.s32.totalorder %s622_s15, 2  ;;  %s322_s26 = scalar_lea.sflag [#allocation4], %s321_s25 }
 0x14c   : > { %p444_p3 = pnand %p883_p13, %p882_p10 }
 0x14e   : > { %605 = dma.done.wait (!%p444_p3), %s322_s26, 256  }
 0x14f   : > { %607 = vsyncadd (!%p444_p3), %s322_s26, 4294967040  ;;  %p17_p7 = scmp.ge.s32.totalorder %s709_s24, 4   ;;  %s884_s12 = smov %s614_s13 }
 0x150   : > { %s885_s13 = smov %s618_s14  ;;  %s886_s14 = smov %s743_s17 }
 0x151   : > { %s887_s15 = smov %s709_s24  ;;  %19 = sbr.rel (!%p17_p7) target bundleno = 6 (0x6), region = 81 }
 0x158   :  { %327 = vsyncpa [#allocation3], 1 }
 0x159   :  { %329 = vsyncpa [#allocation3 + $0x1], 1 }
 0x15a   :  { %330 = vsyncpa [#allocation6], 1 }
 0x15b   :  { %331 = vsyncpa [#allocation4], 1 }
 0x15c   :  { %333 = vsyncpa [#allocation4 + $0x1], 1 }

</bundles_post_ra>
